<compile_context>
chip_gen: v7x
topology: tpu7x:2x2x1
jax: 0.10.0
libtpu: 0.0.40
codegen_flags: <defaults>
</compile_context>

<pallas_src>
import jax
import jax.numpy as jnp
from jax import lax
from jax.experimental import pallas as pl
from jax.experimental.pallas import tpu as pltpu


def _conv3x3_residual_kernel(p_ref, w_ref, x0_ref, o_ref):
    # p_ref  : (1, 9*Cin, HW)   im2col patches for one batch element
    # w_ref  : (Cout, 9*Cin)    packed conv weights (resident across grid)
    # x0_ref : (1, Cout, HW)    residual (NCHW flattened)
    # o_ref  : (1, Cout, HW)    output   (NCHW flattened, lane-dense)
    conv = lax.dot_general(
        w_ref[...], p_ref[0],
        dimension_numbers=(((1,), (0,)), ((), ())),
        preferred_element_type=jnp.float32,
    )  # (Cout, HW) f32
    o_ref[0] = (conv + x0_ref[0].astype(jnp.float32)).astype(o_ref.dtype)


def cnnblock1_forward(x_nchw, x0_nchw, weight_oihw):
    """Pallas implementation of CNNBlock1.forward.

    x_nchw      : (B, Cin,  H, W)   -- conv input
    x0_nchw     : (B, Cout, H, W)   -- residual
    weight_oihw : (Cout, Cin, 3, 3) -- PyTorch Conv2d weight layout
    returns     : (B, Cout, H, W)
    """
    B, Cin, H, W = x_nchw.shape
    Cout = weight_oihw.shape[0]
    HW = H * W
    K = 9 * Cin

    # im2col in the wrapper (stays in NCHW ordering; XLA fuses pad+slices):
    # patches[b, c*9 + ky*3 + kx, i*W + j] = xp[b, c, i+ky, j+kx]
    xp = jnp.pad(x_nchw, ((0, 0), (0, 0), (1, 1), (1, 1)))
    patches = jnp.stack(
        [xp[:, :, ky:ky + H, kx:kx + W] for ky in range(3) for kx in range(3)],
        axis=2,
    )                                   # (B, Cin, 9, H, W)
    patches = patches.reshape(B, K, HW)

    # (Cout, Cin, 3, 3) -> (Cout, 9*Cin); index order matches patches.
    w_packed = weight_oihw.reshape(Cout, K)

    x0_flat = x0_nchw.reshape(B, Cout, HW)

    out_flat = pl.pallas_call(
        _conv3x3_residual_kernel,
        out_shape=jax.ShapeDtypeStruct((B, Cout, HW), x_nchw.dtype),
        grid_spec=pltpu.PrefetchScalarGridSpec(
            num_scalar_prefetch=0,
            grid=(B,),
            in_specs=[
                pl.BlockSpec((1, K, HW), lambda b: (b, 0, 0)),
                pl.BlockSpec((Cout, K), lambda b: (0, 0)),   # resident weights
                pl.BlockSpec((1, Cout, HW), lambda b: (b, 0, 0)),
            ],
            out_specs=pl.BlockSpec((1, Cout, HW), lambda b: (b, 0, 0)),
        ),
        compiler_params=pltpu.CompilerParams(
            dimension_semantics=("parallel",),   # 2 TCs on v7x take one b each
        ),
    )(patches, w_packed, x0_flat)

    # Flattened NCHW -> NCHW: pure reshape, no transpose.
    return out_flat.reshape(B, Cout, H, W)


def _reference_forward(x_nchw, x0_nchw, weight_oihw):
    # Pure-JAX reference (lax conv) for correctness check.
    conv = lax.conv_general_dilated(
        x_nchw.astype(jnp.float32),
        weight_oihw.astype(jnp.float32),
        window_strides=(1, 1),
        padding=((1, 1), (1, 1)),
        dimension_numbers=("NCHW", "OIHW", "NCHW"),
    )
    return conv + x0_nchw.astype(jnp.float32)


if __name__ == "__main__":
    # Small shapes consistent with the module:
    #   n_channels (conv in-channels) = 8, image_channels (conv out-channels) = 4
    B, n_channels, image_channels, H, W = 2, 8, 4, 16, 16

    key = jax.random.PRNGKey(0)
    kx, kx0, kw = jax.random.split(key, 3)

    x = jax.random.normal(kx, (B, n_channels, H, W), dtype=jnp.float32)
    x0 = jax.random.normal(kx0, (B, image_channels, H, W), dtype=jnp.float32)
    # Deterministic Conv2d weight init (Kaiming-uniform-ish scale).
    fan_in = n_channels * 3 * 3
    bound = 1.0 / (fan_in ** 0.5)
    weight = jax.random.uniform(
        kw, (image_channels, n_channels, 3, 3),
        minval=-bound, maxval=bound, dtype=jnp.float32)

    out = cnnblock1_forward(x, x0, weight)
    out = jax.block_until_ready(out)

    ref = jax.block_until_ready(_reference_forward(x, x0, weight))
    assert out.shape == (B, image_channels, H, W)
    assert jnp.allclose(out, ref, atol=1e-3, rtol=1e-3), "mismatch vs reference"

    print("KERNEL_OK")
</pallas_src>

<mosaic_0001>
module attributes {stable_mosaic.version = 11 : i64} {
  func.func @_conv3x3_residual_kernel(%arg0: i32, %arg1: memref<1x72x256xf32, #tpu.memory_space<vmem>>, %arg2: memref<4x72xf32, #tpu.memory_space<vmem>>, %arg3: memref<1x4x256xf32, #tpu.memory_space<vmem>>, %arg4: memref<1x4x256xf32, #tpu.memory_space<vmem>>) attributes {dimension_semantics = [#tpu.dimension_semantics<parallel>], iteration_bounds = array<i64: 2>, scalar_prefetch = 0 : i64, scratch_operands = 0 : i64, tpu.core_type = #tpu.core_type<tc>, window_params = [{transform_indices = @transform_0, window_bounds = array<i64: 1, 72, 256>}, {pipeline_mode = #tpu.pipeline_mode<synchronous>, transform_indices = @transform_1, window_bounds = array<i64: 4, 72>}, {transform_indices = @transform_2, window_bounds = array<i64: 1, 4, 256>}, {transform_indices = @transform_3, window_bounds = array<i64: 1, 4, 256>}]} {
    %c0 = arith.constant 0 : index
    %c0_0 = arith.constant 0 : index
    %0 = vector.load %arg2[%c0, %c0_0] : memref<4x72xf32, #tpu.memory_space<vmem>>, vector<4x72xf32>
    %c0_1 = arith.constant 0 : index
    %c0_2 = arith.constant 0 : index
    %c0_3 = arith.constant 0 : index
    %1 = vector.load %arg1[%c0_1, %c0_2, %c0_3] : memref<1x72x256xf32, #tpu.memory_space<vmem>>, vector<1x72x256xf32>
    %2 = vector.shape_cast %1 : vector<1x72x256xf32> to vector<72x256xf32>
    %cst = arith.constant dense<0.000000e+00> : vector<4x256xf32>
    %3 = tpu.matmul %0, %2, %cst {dimension_numbers = #tpu.dot_dimension_numbers<[1], [0], [0], [1], [0, 0, 1, 1], [], []>} : vector<4x72xf32>, vector<72x256xf32>, vector<4x256xf32> -> vector<4x256xf32>
    %c0_4 = arith.constant 0 : index
    %c0_5 = arith.constant 0 : index
    %c0_6 = arith.constant 0 : index
    %4 = vector.load %arg3[%c0_4, %c0_5, %c0_6] : memref<1x4x256xf32, #tpu.memory_space<vmem>>, vector<1x4x256xf32>
    %5 = vector.shape_cast %4 : vector<1x4x256xf32> to vector<4x256xf32>
    %6 = arith.addf %3, %5 : vector<4x256xf32>
    %c0_7 = arith.constant 0 : index
    %c0_8 = arith.constant 0 : index
    %c0_9 = arith.constant 0 : index
    %7 = vector.load %arg4[%c0_7, %c0_8, %c0_9] : memref<1x4x256xf32, #tpu.memory_space<vmem>>, vector<1x4x256xf32>
    %8 = vector.shape_cast %7 : vector<1x4x256xf32> to vector<4x256xf32>
    %9 = vector.shape_cast %6 : vector<4x256xf32> to vector<1x4x256xf32>
    tpu.vector_store %arg4[%c0_7, %c0_8, %c0_9], %9 {strides = array<i32>} : memref<1x4x256xf32, #tpu.memory_space<vmem>>, vector<1x4x256xf32>,
    return
  }
  func.func @transform_0(%arg0: i32) -> (i32, i32, i32) {
    %c0_i32 = arith.constant 0 : i32
    %c0_i32_0 = arith.constant 0 : i32
    %c0_i32_1 = arith.constant 0 : i32
    return %arg0, %c0_i32, %c0_i32_0 : i32, i32, i32
  }
  func.func @transform_1(%arg0: i32) -> (i32, i32) {
    %c0_i32 = arith.constant 0 : i32
    %c0_i32_0 = arith.constant 0 : i32
    %c0_i32_1 = arith.constant 0 : i32
    return %c0_i32, %c0_i32_0 : i32, i32
  }
  func.func @transform_2(%arg0: i32) -> (i32, i32, i32) {
    %c0_i32 = arith.constant 0 : i32
    %c0_i32_0 = arith.constant 0 : i32
    %c0_i32_1 = arith.constant 0 : i32
    return %arg0, %c0_i32, %c0_i32_0 : i32, i32, i32
  }
  func.func @transform_3(%arg0: i32) -> (i32, i32, i32) {
    %c0_i32 = arith.constant 0 : i32
    %c0_i32_0 = arith.constant 0 : i32
    %c0_i32_1 = arith.constant 0 : i32
    return %arg0, %c0_i32, %c0_i32_0 : i32, i32, i32
  }
}

</mosaic_0001>

<bundles_post_ra>
// kernel: tpu_custom_call.1
= control target key start
LH: loop header
LB: loop body
LE: loop exit
PB: predicated region body
PF: predicated region fallthrough
CT: control target
= control target key end

     0   :  { %8 = vsyncpa [#allocation3], 0  ;;  %s1017_s0 = inlined_call_operand.hbm [shape: f32[2,72,256], index: 0, kind: input, shape index: {}]   ;;  %s1018_s1 = inlined_call_operand.hbm [shape: f32[4,72], index: 1, kind: input, shape index: {}]   ;;  %s1019_s2 = inlined_call_operand.hbm [shape: f32[2,4,256], index: 2, kind: input, shape index: {}]   ;;  %s1020_s3 = inlined_call_operand.hbm [shape: f32[2,4,256], index: 3, kind: output, shape index: {}]  }
   0x1   :  { %10 = vsyncpa [#allocation3 + $0x1], 0 }
   0x2   :  { %11 = vsyncpa [#allocation6], 0 }
   0x3   :  { %12 = vsyncpa [#allocation4], 0 }
   0x4   :  { %14 = vsyncpa [#allocation4 + $0x1], 0  ;;  %s751_s12 = smov 0   ;;  %s753_s13 = smov 0  }
   0x5   :  { %s755_s14 = smov 0   ;;  %s757_s15 = smov 0  }
   0x6 LB: > { %s772_s16 = sadd.s32 1, %s722_s15   ;;  %s27_s17 = sadd.s32 1, %s718_s14  ;;  %s722_s15 = sphi %s757_s15, %s1043_s15   ;;  %s718_s14 = sphi %s755_s14, %s1042_s14   ;;  %s714_s13 = sphi %s753_s13, %s1041_s13   ;;  %s710_s12 = sphi %s751_s12, %s1040_s12  }
   0x7   : > { %s24_s18 = ssub.s32 %s722_s15, %s772_s16  ;;  %p34_p0 = scmp.ne.s32.totalorder %s718_s14, %s714_s13 }
   0x8   : > { %p25_p1 = scmp.eq.s32.totalorder %s24_s18, 0  ;;  %p35_p2 = scmp.eq.s32.totalorder %s722_s15, 0 }
   0x9   : > { %p520_p4 = scmp.lt.s32.totalorder %s722_s15, 2  ;;  %s148_s20 = sand.u32 1, %s722_s15  }
   0xa   : > { %s783_s19 = scalar_select %p25_p1, %s718_s14, %s27_s17  }
   0xb   : > { %p36_p5 = por %p35_p2, %p34_p0  ;;  %s150_s21 = sand.u32 1, %s718_s14  }
   0xc   : > { %s491_s22 = smul.u32 144, %s150_s21  ;;  %s804_s30 = scalar_lea.sflag [#allocation3], %s148_s20 }
   0xd   : > { %p792_p6 = pnand %p520_p4, %p36_p5  ;;  %s492_s24 = smul.u32 2304, %s722_s15 }
   0xe   : > { %s152_s28 = scalar_lea.vmem [#allocation2], %s491_s22  ;;  %s565_s7 = scalar_lea.hbm %s1017_s0, 4608 }
   0xf   : > { %s800_s27 = scalar_lea.hbm %s1017_s0, %s492_s24  ;;  %s159_s29 = sshll.u32 %s152_s28, 4  ;;  %s802_s29 = int_to_ptr.vmem [resolvable:$true] %s159_s29 }
  0x10   : > { %s560_s4 = scalar_lea.hbm %s800_s27, 2304  ;;  %p562_p8 = pneg %p792_p6 }
  0x11   : > { %p561_p7 = scmp.ne.s32.totalorder %s800_s27, %s560_s4  ;;  %p566_p11 = scmp.lt.u32.totalorder %s800_s27, %s1017_s0 }
  0x12   : > { %p567_p12 = scmp.lt.u32.totalorder %s565_s7, %s560_s4  ;;  %p569_p1 = scmp.lt.u32.totalorder %s560_s4, %s800_s27 }
  0x13   : > { %p563_p9 = pnand %p562_p8, %p561_p7 }
  0x14   : > { %p568_p13 = por %p567_p12, %p566_p11 }
  0x15   : > { %p564_p10 = pneg %p563_p9 }
  0x16   : > { %p570_p2 = por %p569_p1, %p568_p13 }
  0x18   : > { %p571_p4 = pnand %p570_p2, %p564_p10 }
  0x1a   : > { %574 = shalt.err (!%p571_p4)
}
  0x1b   : > { %s575_s10 = scalar_lea.vmem %s802_s29, 2304  ;;  %s724_s11 = smov [#allocation2]  }
  0x1c   : > { %p576_p5 = scmp.ne.s32.totalorder %s802_s29, %s575_s10  ;;  %s580_s17 = sshll.u32 %s724_s11, 4  ;;  %s581_s17 = int_to_ptr.vmem [resolvable:$false] %s580_s17 }
  0x1d   : > { %s582_s18 = scalar_lea.vmem %s581_s17, 4608  ;;  %p583_p3 = scmp.lt.s32.totalorder %s802_s29, %s581_s17 }
  0x1e   : > { %p578_p7 = pnand %p576_p5, %p562_p8  ;;  %p584_p11 = scmp.lt.s32.totalorder %s582_s18, %s575_s10 }
  0x20   : > { %p579_p9 = pneg %p578_p7  ;;  %p585_p12 = por %p584_p11, %p583_p3 }
  0x22   : > { %p586_p13 = pnand %p585_p12, %p579_p9 }
  0x24   : > { %589 = shalt.err (!%p586_p13)
}
  0x25   : > { %s725_s20 = smov 256   ;;  %s726_s22 = smov 16  }
  0x26   : > { %511 = dma.hbm_to_vmem [thread:$0]  (!%p792_p6), %s800_s27, 2304, %s802_s29, %s804_s30, %s725_s20, %s725_s20, %s726_s22  }
  0x27   : > { %s833_s24 = sadd.s32 4294967295, %s722_s15   ;;  %s455_s25 = sadd.s32 4294967294, %s722_s15  }
  0x28   : > { %p40_p3 = scmp.ne.s32.totalorder %s714_s13, %s710_s12  ;;  %p1021_p10 = scmp.eq.s32.totalorder %s833_s24, 0 }
  0x29   : > { %p111_p1 = scmp.eq.s32.totalorder %s833_s24, 1  ;;  %p117_p2 = scmp.eq.s32.totalorder %s455_s25, 1 }
  0x2a   : > { %p842_p4 = por %p1021_p10, %p40_p3  ;;  %p456_p5 = scmp.ge.s32.totalorder %s722_s15, 1 }
  0x2b   : > { %p850_p7 = por %p111_p1, %p34_p0  ;;  %p854_p9 = por %p117_p2, %p40_p3 }
  0x2c   : > { %s1027_s26 = scalar_select %p842_p4, 1, 0 }
  0x2d   : > { %s1028_s27 = scalar_select %p850_p7, 1, 0 }
  0x2e   : > { %s1029_s28 = scalar_select %p854_p9, 1, 0 }
  0x2f   : > { %p124_p11 = scmp.lt.s32.totalorder %s722_s15, 3  ;;  %s460_s29 = sshll.u32 %s150_s21, 3 }
  0x30   : > { %s727_s5 = smov [#allocation5]   ;;  %s473_s7 = sshll.u32 %s722_s15, 7 }
  0x31   : > { %p861_p12 = pnand %p456_p5, %p124_p11  ;;  %s137_s6 = sshll.u32 %s727_s5, 4  ;;  %s865_s6 = int_to_ptr.vmem [resolvable:$true] %s137_s6 }
  0x32   : > { %s873_s10 = scalar_lea.hbm %s1019_s2, %s473_s7  ;;  %s173_s21 = scalar_lea.vmem [#allocation7], %s460_s29 }
  0x33   : > { %s1030_s4 = scalar_select %p861_p12, 1, 0 }
  0x34   : > { %p504_p0 = pneg %p861_p12  ;;  %s181_s11 = sshll.u32 %s173_s21, 4  ;;  %s182_s11 = int_to_ptr.vmem [resolvable:$true] %s181_s11 }
  0x35   : > { %s590_s18 = scalar_lea.hbm %s873_s10, 128  ;;  %s595_s25 = scalar_lea.hbm %s1019_s2, 256 }
  0x36   : > { %p877_p13 = pnand %p504_p0, %p1021_p10  ;;  %p591_p3 = scmp.ne.s32.totalorder %s873_s10, %s590_s18 }
  0x37   : > { %p596_p5 = scmp.lt.u32.totalorder %s873_s10, %s1019_s2  ;;  %p597_p11 = scmp.lt.u32.totalorder %s595_s25, %s590_s18 }
  0x38   : > { %s1031_s17 = scalar_select %p877_p13, 1, 0 }
  0x39   : > { %p593_p1 = pnand %p591_p3, %p562_p8  ;;  %p598_p0 = por %p597_p11, %p596_p5 }
  0x3a   : > { %p599_p10 = scmp.lt.u32.totalorder %s590_s18, %s873_s10 }
  0x3b   : > { %p594_p2 = pneg %p593_p1 }
  0x3c   : > { %p600_p9 = por %p599_p10, %p598_p0 }
  0x3e   : > { %p601_p7 = pnand %p600_p9, %p594_p2 }
  0x40   : > { %604 = shalt.err (!%p601_p7)
}
  0x41   : > { %s605_s29 = scalar_lea.vmem %s182_s11, 128  ;;  %s728_s8 = smov [#allocation7]  }
  0x42   : > { %p606_p4 = scmp.ne.s32.totalorder %s182_s11, %s605_s29  ;;  %s610_s9 = sshll.u32 %s728_s8, 4  ;;  %s611_s9 = int_to_ptr.vmem [resolvable:$false] %s610_s9 }
  0x43   : > { %s612_s21 = scalar_lea.vmem %s611_s9, 256  ;;  %p613_p12 = scmp.lt.s32.totalorder %s182_s11, %s611_s9 }
  0x44   : > { %p608_p3 = pnand %p606_p4, %p562_p8  ;;  %p614_p13 = scmp.lt.s32.totalorder %s612_s21, %s605_s29 }
  0x46   : > { %p609_p1 = pneg %p608_p3  ;;  %p615_p5 = por %p614_p13, %p613_p12 }
  0x48   : > { %p616_p11 = pnand %p615_p5, %p609_p1 }
  0x4a   : > { %619 = shalt.err (!%p616_p11)
}
  0x4b   : > { %514 = dma.hbm_to_vmem [thread:$0]  (!%p792_p6), %s873_s10, 128, %s182_s11, %s804_s30  }
  0x4c   : > { %s620_s22 = scalar_lea.hbm %s1018_s1, 64  ;;  %p1032_p10 = scmp.ne.s32.totalorder %s1031_s17, 0 }
  0x4d   : > { %p621_p8 = scmp.ne.s32.totalorder %s1018_s1, %s620_s22  ;;  %p627_p12 = scmp.lt.u32.totalorder %s620_s22, %s1018_s1 }
  0x4e   : > { %p622_p4 = pneg %p1032_p10 }
  0x50   : > { %p623_p7 = pnand %p622_p4, %p621_p8 }
  0x52   : > { %p624_p9 = pneg %p623_p7 }
  0x54   : > { %p629_p13 = pnand %p627_p12, %p624_p9 }
  0x56   : > { %632 = shalt.err (!%p629_p13)
}
  0x57   : > { %s633_s23 = scalar_lea.vmem %s865_s6, 64  ;;  %p641_p3 = scmp.lt.s32.totalorder %s865_s6, %s865_s6 }
  0x58   : > { %p634_p6 = scmp.ne.s32.totalorder %s865_s6, %s633_s23  ;;  %p642_p1 = scmp.lt.s32.totalorder %s633_s23, %s633_s23 }
  0x5a   : > { %p636_p2 = pnand %p634_p6, %p622_p4  ;;  %p643_p5 = por %p642_p1, %p641_p3 }
  0x5c   : > { %p637_p0 = pneg %p636_p2 }
  0x5e   : > { %p644_p11 = pnand %p643_p5, %p637_p0 }
  0x60   : > { %647 = shalt.err (!%p644_p11)
}
  0x61   : > { %507 = dma.hbm_to_vmem [thread:$0]  (!%p1032_p10), %s1018_s1, 64, %s865_s6, [#allocation6]  }
  0x62   : > { %p1033_p8 = scmp.ne.s32.totalorder %s1030_s4, 0 }
  0x63   : > { %s192_s11 = sand.u32 (!%p1033_p8), 1, %s833_s24   ;;  %s926_s8 = sand.u32 (!%p1033_p8), 1, %s714_s13  }
  0x64   : > { %190 = sbr.rel (%p1033_p8) target bundleno = 366 (0x16e), region = 32  ;;  %s193_s21 = scalar_lea.sflag (!%p1033_p8), [#allocation3], %s192_s11 }
  0x65   : > { %s493_s9 = smul.u32 (!%p1033_p8), 144, %s926_s8  ;;  %p1034_p4 = scmp.ne.s32.totalorder (!%p1033_p8), %s1027_s26, 0 }
  0x67   : > { %s929_s18 = scalar_lea.vmem (!%p1033_p8), [#allocation2], %s493_s9 }
  0x6b   : > { %693 = dma.done.wait (%p1034_p4), %s193_s21, 2304  }
  0x6c   : > { %695 = vsyncadd (%p1034_p4), %s193_s21, 4294964992  ;;  %p1035_p10 = scmp.eq.s32.totalorder %s833_s24, 0 }
  0x6e   : > { %697 = dma.done.wait (%p1035_p10), [#allocation6], 64   ;;  %p1036_p7 = pmov %p1035_p10 }
  0x6f   : > { %s465_s4 = sshll.u32 %s926_s8, 3 }
  0x70   : > { %699 = vsyncadd (%p1036_p7), [#allocation6], 4294967232  ;;  %s942_s6 = scalar_lea.vmem [#allocation7], %s465_s4 }
  0x71   : > { %701 = dma.done.wait (%p1034_p4), %s193_s21, 128  }
  0x72   : > { %703 = vsyncadd (%p1034_p4), %s193_s21, 4294967168  ;;  %v729_v0 = vmov 0.0   ;;  %v239_v1 = vld [vmem:[%s929_s18 + $0x8] sm:$0xff]  ;;  %v241_v2 = vld [vmem:[%s929_s18 + $0x18] sm:$0xff]  ;;  %vm260_vm0 = vcmask 588800   ;;  %s474_s26 = sshll.u32 %s833_s24, 7 }
  0x73   : > { %328 = vmatprep.mubr.f32.mxu0 %v729_v0  ;;  %v238_v3 = vld [vmem:[%s929_s18] sm:$0xff]  ;;  %v475_v4 = vpack.c.bf16 %v241_v2, %v239_v1  ;;  %v240_v5 = vld [vmem:[%s929_s18 + $0x10] sm:$0xff]  ;;  %v243_v6 = vld [vmem:[%s929_s18 + $0x28] sm:$0xff]  ;;  %s236_s17 = scalar_lea.vmem [#allocation8], %s465_s4  ;;  %s973_s5 = scalar_lea.hbm %s1020_s3, %s474_s26 }
  0x74   : > { %v245_v7 = vld [vmem:[%s929_s18 + $0x38] sm:$0xff]  ;;  %v477_v8 = vpack.c.bf16 %v240_v5, %v238_v3  ;;  %v242_v10 = vld [vmem:[%s929_s18 + $0x20] sm:$0xff]  ;;  %v244_v11 = vld [vmem:[%s929_s18 + $0x30] sm:$0xff]  ;;  %s355_s20 = sshll.u32 %s236_s17, 4  ;;  %s341_s7 = scalar_lea.sflag [#allocation4], %s926_s8  ;;  %s975_s20 = int_to_ptr.vmem [resolvable:$true] %s355_s20 }
  0x75   : > { %v479_v9 = vpack.c.bf16 %v245_v7, %v243_v6  ;;  %v247_v12 = vld [vmem:[%s929_s18 + $0x48] sm:$0xff]  ;;  %476 = vmatprep.subr.bf16.mxu0 %v475_v4  ;;  %v249_v13 = vld [vmem:[%s929_s18 + $0x58] sm:$0xff]  ;;  %v481_v14 = vpack.c.bf16 %v244_v11, %v242_v10  ;;  %v246_v16 = vld [vmem:[%s929_s18 + $0x40] sm:$0xff]  ;;  %s648_s29 = scalar_lea.vmem %s975_s20, 128  ;;  %p1037_p12 = scmp.ne.s32.totalorder %s1028_s27, 0 }
  0x76   : > { %478 = vmatpush1.bf16.msra.mxu0 %v477_v8  ;;  %v483_v15 = vpack.c.bf16 %v249_v13, %v247_v12  ;;  %v248_v17 = vld [vmem:[%s929_s18 + $0x50] sm:$0xff]  ;;  %v251_v18 = vld [vmem:[%s929_s18 + $0x68] sm:$0xff]  ;;  %v253_v19 = vld [vmem:[%s929_s18 + $0x78] sm:$0xff]  ;;  %p649_p9 = scmp.ne.s32.totalorder %s975_s20, %s648_s29  ;;  %s730_s24 = smov [#allocation8]  }
  0x77   : > { %480 = vmatprep.subr.bf16.mxu0 %v479_v9  ;;  %v485_v20 = vpack.c.bf16 %v248_v17, %v246_v16  ;;  %v487_v21 = vpack.c.bf16 %v253_v19, %v251_v18  ;;  %v250_v22 = vld [vmem:[%s929_s18 + $0x60] sm:$0xff]  ;;  %v252_v23 = vld [vmem:[%s929_s18 + $0x70] sm:$0xff]  ;;  %v255_v25 = vld [vmem:[%s929_s18 + $0x88] sm:$0xff]  ;;  %s652_s23 = sshll.u32 %s730_s24, 4  ;;  %s653_s23 = int_to_ptr.vmem [resolvable:$false] %s652_s23 }
  0x78   : > { %v489_v24 = vpack.c.bf16 %v252_v23, %v250_v22  ;;  %v254_v26 = vld [vmem:[%s929_s18 + $0x80] sm:$0xff]  ;;  %p650_p13 = pnand %p649_p9, %p1037_p12  ;;  %s654_s30 = scalar_lea.vmem %s653_s23, 256 }
  0x79   : > { %v237_v27 = vld [vmem:[#allocation5] sm:$0xf]  ;;  %v256_v28 = vld [vmem:[%s942_s6] sm:$0xff]  ;;  %p655_p2 = scmp.lt.s32.totalorder %s975_s20, %s653_s23  ;;  %p656_p0 = scmp.lt.s32.totalorder %s654_s30, %s648_s29 }
  0x7a   : > { %482 = vmatpush1.bf16.msra.mxu0 %v481_v14  ;;  %v258_v29 = vcombine.high %v256_v28, %v256_v28  ;;  %p651_p6 = pneg %p650_p13 }
  0x7b   : > { %484 = vmatprep.subr.bf16.mxu0 %v483_v15  ;;  %p657_p3 = por %p656_p0, %p655_p2 }
  0x7d   : > { %p658_p1 = pnand %p657_p3, %p651_p6 }
  0x7e   : > { %486 = vmatpush1.bf16.msra.mxu0 %v485_v20 }
  0x7f   : > { %488 = vmatprep.subr.bf16.mxu0 %v487_v21 }
  0x82   : > { %490 = vmatpush1.bf16.msra.mxu0 %v489_v24 }
  0x83   : > { %280 = vmatprep.subr.mxu0 %v255_v25 }
  0x86   : > { %281 = vmatpush1.msra.mxu0 %v254_v26 }
  0x87   : > { %467 = vmatmul.mubr.msk.f32.vlgmr.msra.gmra.mrb[0].mxu0 %vm260_vm0, %v237_v27 }
 0x15a   : > { %v330_v30 = vpop.f32.mrb[0].mxu0 }
 0x15b   : > { %v331_v31 = vadd.f32 %v330_v30, %v256_v28  ;;  %v332_v32 = vpop.f32.mrb[1].mxu0 }
 0x15c   : > { %v333_v33 = vadd.f32 %v332_v32, %v258_v29 }
 0x15e   : > { %v337_v34 = vcombine.low %v331_v31, %v333_v33 }
 0x160   : > { %339 = vst [vmem:[%s236_s17] sm:$0xff] %v337_v34 }
 0x161   : > { %661 = shalt.err (!%p658_p1)
}
 0x162   : > { %s662_s10 = scalar_lea.hbm %s973_s5, 128  ;;  %s666_s9 = scalar_lea.hbm %s1020_s3, 256 }
 0x163   : > { %p663_p5 = scmp.ne.s32.totalorder %s973_s5, %s662_s10  ;;  %p667_p4 = scmp.lt.u32.totalorder %s973_s5, %s1020_s3 }
 0x164   : > { %p668_p10 = scmp.lt.u32.totalorder %s666_s9, %s662_s10  ;;  %p670_p9 = scmp.lt.u32.totalorder %s662_s10, %s973_s5 }
 0x165   : > { %p664_p11 = pnand %p663_p5, %p1037_p12 }
 0x166   : > { %p669_p7 = por %p668_p10, %p667_p4 }
 0x167   : > { %p665_p8 = pneg %p664_p11 }
 0x168   : > { %p671_p13 = por %p670_p9, %p669_p7 }
 0x16a   : > { %p672_p6 = pnand %p671_p13, %p665_p8 }
 0x16c   : > { %675 = shalt.err (!%p672_p6)
}
 0x16d   : > { %502 = dma.vmem_to_hbm [thread:$0]  (%p1037_p12), %s975_s20, 128, %s973_s5, %s341_s7  }
 0x16e PF: > { %s367_s4 = sand.u32 1, %s710_s12   ;;  %p1038_p2 = scmp.ne.s32.totalorder %s1029_s28, 0 }
 0x16f   : > { %p1039_p0 = scmp.ge.s32.totalorder %s722_s15, 2  ;;  %s368_s6 = scalar_lea.sflag [#allocation4], %s367_s4 }
 0x171   : > { %p516_p3 = pnand %p1039_p0, %p1038_p2 }
 0x173   : > { %705 = dma.done.wait (!%p516_p3), %s368_s6, 128  }
 0x174   : > { %707 = vsyncadd (!%p516_p3), %s368_s6, 4294967168  ;;  %p17_p1 = scmp.ge.s32.totalorder %s772_s16, 4   ;;  %s1040_s12 = smov %s714_s13 }
 0x175   : > { %s1041_s13 = smov %s718_s14  ;;  %s1042_s14 = smov %s783_s19 }
 0x176   : > { %s1043_s15 = smov %s772_s16  ;;  %19 = sbr.rel (!%p17_p1) target bundleno = 6 (0x6), region = 92 }
 0x17d   :  { %373 = vsyncpa [#allocation3], 1 }
 0x17e   :  { %375 = vsyncpa [#allocation3 + $0x1], 1 }
 0x17f   :  { %376 = vsyncpa [#allocation6], 1 }
 0x180   :  { %377 = vsyncpa [#allocation4], 1 }
 0x181   :  { %379 = vsyncpa [#allocation4 + $0x1], 1 }

</bundles_post_ra>
